<compile_context>
chip_gen: v6e
topology: v6e:2x2x1
jax: 0.10.0
libtpu: 0.0.40
codegen_flags: <defaults>
</compile_context>

<pallas_src>
import math
from functools import partial

import jax
import jax.numpy as jnp
from jax import lax
from jax.experimental import pallas as pl
from jax.experimental.pallas import tpu as pltpu


def _mha_kernel(qp_ref, kp_ref, vp_ref, mask_ref, wo_ref, o_ref,
                acc_ref, *, approx_recip):
    """One (batch, q-tile, head) grid step.

    qp_ref:   (1, 1, TQ, dh)  projected+scaled queries (compute dtype)
    kp_ref:   (1, 1, S,  dh)  projected keys
    vp_ref:   (1, 1, S,  dh)  projected values
    mask_ref: (1, 1, TQ, S )  additive mask (1.0 == forbidden)
    wo_ref:   (1, dh, D)      this head's slab of the output projection
    o_ref:    (1, TQ, D)      output tile
    acc_ref:  (TQ, D) f32     output-projection accumulator across heads
    """
    h = pl.program_id(2)

    # Correct only because the head axis is innermost and marked "arbitrary":
    # the output block (and acc scratch) stay resident across the head loop.
    @pl.when(h == 0)
    def _init():
        acc_ref[...] = jnp.zeros_like(acc_ref)

    qp = qp_ref[0, 0]                                   # (TQ, dh)
    kp = kp_ref[0, 0]                                   # (S,  dh)
    vp = vp_ref[0, 0]                                   # (S,  dh)
    wo = wo_ref[0]                                      # (dh, D)

    # Q @ K^T without materializing a transposed K tile: contract last dims.
    g = lax.dot_general(qp, kp, (((1,), (1,)), ((), ())),
                        preferred_element_type=jnp.float32)          # (TQ, S)
    # Additive mask (scale is already folded into qp).  Fused mul-sub in f32.
    g = g - mask_ref[0, 0].astype(jnp.float32) * 1e9

    # Numerically-stable softmax along keys (kept in f32 for v5e safety).
    g = g - jnp.max(g, axis=-1, keepdims=True)
    p = jnp.exp(g)
    a = p * pl.reciprocal(jnp.sum(p, axis=-1, keepdims=True),
                          approx=approx_recip)

    head_out = jnp.dot(a.astype(vp.dtype), vp,
                       preferred_element_type=jnp.float32)           # (TQ, dh)

    # Accumulate this head's contribution to the output projection.
    acc_ref[...] += jnp.dot(head_out.astype(wo.dtype), wo,
                            preferred_element_type=jnp.float32)      # (TQ, D)

    @pl.when(h == pl.num_programs(2) - 1)
    def _finalize():
        o_ref[0] = acc_ref[...].astype(o_ref.dtype)


def mha_forward(q, k, v, mask, wq, wk, wv, wo, *, heads,
                block_q=256, compute_dtype=jnp.bfloat16, approx_recip=False):
    """MHAttention forward.

    compute_dtype=bfloat16 (default) feeds bf16 to the MXU with f32
    accumulation; pass jnp.float32 for a bit-accurate (slower) path.
    block_q: sweep up to 512 on v6e; keep ~128-256 on v7x (64 MiB VMEM).
    """
    B, Sq, D = q.shape
    Sk = k.shape[1]
    assert D % heads == 0, "dim must be divisible by heads"
    depth = D // heads
    inv_norm = 1.0 / math.sqrt(depth)
    assert mask.shape == (B, 1, Sq, Sk), "mask must be (B, 1, Sq, Sk)"

    block_q = min(block_q, Sq)
    assert Sq % block_q == 0, "seq length must be divisible by the query tile"
    assert block_q == Sq or block_q % 8 == 0
    nq = Sq // block_q

    # --- Hoisted projections (run once, full lane density, by XLA). ---------
    proj_prec = (lax.Precision.HIGHEST
                 if jnp.dtype(compute_dtype) == jnp.float32
                 else lax.Precision.DEFAULT)

    def _project(x, w):
        w_h = w.reshape(D, heads, depth).astype(compute_dtype)
        return jnp.einsum("bsd,dhe->bhse", x.astype(compute_dtype), w_h,
                          precision=proj_prec,
                          preferred_element_type=jnp.float32)

    qp = (_project(q, wq) * inv_norm).astype(compute_dtype)   # (B, H, Sq, dh)
    kp = _project(k, wk).astype(compute_dtype)                 # (B, H, Sk, dh)
    vp = _project(v, wv).astype(compute_dtype)                 # (B, H, Sk, dh)
    wo_h = wo.reshape(heads, depth, D).astype(compute_dtype)   # (H, dh, D)

    # --- VMEM budget derived from actual tile sizes (not hard-coded). -------
    cdt = jnp.dtype(compute_dtype).itemsize
    mdt = jnp.dtype(mask.dtype).itemsize
    odt = jnp.dtype(q.dtype).itemsize
    est = (2 * block_q * depth * cdt        # qp tile (double-buffered)
           + 2 * 2 * Sk * depth * cdt       # kp + vp tiles
           + 2 * block_q * Sk * mdt         # mask tile
           + 2 * depth * D * cdt            # W_O slab
           + 2 * block_q * D * odt          # output tile
           + block_q * D * 4                # accumulator scratch (f32)
           + 3 * block_q * Sk * 4)          # in-flight f32 logits / softmax temps
    vmem_limit = int(min(64 * 1024 * 1024, max(32 * 1024 * 1024, 2 * est)))

    kernel = partial(_mha_kernel, approx_recip=approx_recip)

    return pl.pallas_call(
        kernel,
        out_shape=jax.ShapeDtypeStruct((B, Sq, D), q.dtype),
        grid_spec=pltpu.PrefetchScalarGridSpec(
            num_scalar_prefetch=0,
            grid=(B, nq, heads),            # heads innermost = accumulation axis
            in_specs=[
                pl.BlockSpec((1, 1, block_q, depth),
                             lambda b, qi, h: (b, h, qi, 0)),   # qp[b, h, tile]
                pl.BlockSpec((1, 1, Sk, depth),
                             lambda b, qi, h: (b, h, 0, 0)),    # kp[b, h]
                pl.BlockSpec((1, 1, Sk, depth),
                             lambda b, qi, h: (b, h, 0, 0)),    # vp[b, h]
                pl.BlockSpec((1, 1, block_q, Sk),
                             lambda b, qi, h: (b, 0, qi, 0)),   # mask[b, tile]
                pl.BlockSpec((1, depth, D),
                             lambda b, qi, h: (h, 0, 0)),       # W_O[h]
            ],
            out_specs=pl.BlockSpec((1, block_q, D),
                                   lambda b, qi, h: (b, qi, 0)),
            scratch_shapes=[
                pltpu.VMEM((block_q, D), jnp.float32),          # output acc
            ],
        ),
        compiler_params=pltpu.CompilerParams(
            dimension_semantics=("parallel", "parallel", "arbitrary"),
            vmem_limit_bytes=vmem_limit,
        ),
    )(qp, kp, vp, mask, wo_h)


def _xavier_uniform(key, fan_in, fan_out):
    # Matches torch.nn.init.xavier_uniform_ with gain=1.0 (deterministic here).
    bound = math.sqrt(6.0 / (fan_in + fan_out))
    return jax.random.uniform(key, (fan_in, fan_out), jnp.float32,
                              minval=-bound, maxval=bound)


def _reference(q, k, v, mask, wq, wk, wv, wo, heads):
    B, S, D = q.shape
    depth = D // heads
    norm = math.sqrt(depth)
    hp = lax.Precision.HIGHEST
    qp = jnp.matmul(q, wq, precision=hp).reshape(B, S, heads, depth).transpose(0, 2, 1, 3)
    kp = jnp.matmul(k, wk, precision=hp).reshape(B, S, heads, depth).transpose(0, 2, 3, 1)
    vp = jnp.matmul(v, wv, precision=hp).reshape(B, S, heads, depth).transpose(0, 2, 1, 3)
    g = jnp.matmul(qp, kp, precision=hp) / norm - mask * 1e9
    a = jax.nn.softmax(g, axis=-1)
    att = jnp.matmul(a, vp, precision=hp).transpose(0, 2, 1, 3).reshape(B, S, D)
    return jnp.matmul(att, wo, precision=hp)


if __name__ == "__main__":
    B, S, DIM, HEADS = 2, 8, 32, 4

    key = jax.random.PRNGKey(0)
    kq, kk, kv, kwq, kwk, kwv, kwo = jax.random.split(key, 7)

    q = jax.random.normal(kq, (B, S, DIM), jnp.float32)
    k = jax.random.normal(kk, (B, S, DIM), jnp.float32)
    v = jax.random.normal(kv, (B, S, DIM), jnp.float32)

    # Causal mask: 1.0 where attention is forbidden, 0.0 where allowed.
    causal = (jnp.arange(S)[:, None] < jnp.arange(S)[None, :]).astype(jnp.float32)
    mask = jnp.broadcast_to(causal, (B, 1, S, S))

    wq = _xavier_uniform(kwq, DIM, DIM)
    wk = _xavier_uniform(kwk, DIM, DIM)
    wv = _xavier_uniform(kwv, DIM, DIM)
    wo = _xavier_uniform(kwo, DIM, DIM)

    ref = _reference(q, k, v, mask, wq, wk, wv, wo, HEADS)

    # Default fast path: bf16 MXU operands, f32 accumulation.
    out = mha_forward(q, k, v, mask, wq, wk, wv, wo, heads=HEADS)
    out = jax.block_until_ready(out)
    assert out.shape == (B, S, DIM)
    assert jnp.all(jnp.isfinite(out))
    # Loose tolerance: bf16 operand rounding through four chained matmuls.
    assert jnp.allclose(out, ref, atol=2e-1, rtol=1e-1), "bf16 path mismatch"

    # Strict correctness check on the f32 path (exact reciprocal).
    out_f32 = mha_forward(q, k, v, mask, wq, wk, wv, wo, heads=HEADS,
                          compute_dtype=jnp.float32, approx_recip=False)
    out_f32 = jax.block_until_ready(out_f32)
    assert jnp.allclose(out_f32, ref, atol=2e-3, rtol=2e-3), "f32 path mismatch"

    print("KERNEL_OK")
</pallas_src>

<mosaic_0001>
module attributes {stable_mosaic.version = 11 : i64} {
  func.func @_mha_kernel(%arg0: i32, %arg1: i32, %arg2: i32, %arg3: memref<1x1x8x8xbf16, #tpu.memory_space<vmem>>, %arg4: memref<1x1x8x8xbf16, #tpu.memory_space<vmem>>, %arg5: memref<1x1x8x8xbf16, #tpu.memory_space<vmem>>, %arg6: memref<1x1x8x8xf32, #tpu.memory_space<vmem>>, %arg7: memref<1x8x32xbf16, #tpu.memory_space<vmem>>, %arg8: memref<1x8x32xf32, #tpu.memory_space<vmem>>, %arg9: memref<8x32xf32, #tpu.memory_space<vmem>>) attributes {dimension_semantics = [#tpu.dimension_semantics<parallel>, #tpu.dimension_semantics<parallel>, #tpu.dimension_semantics<arbitrary>], iteration_bounds = array<i64: 2, 1, 4>, scalar_prefetch = 0 : i64, scratch_operands = 1 : i64, tpu.core_type = #tpu.core_type<tc>, window_params = [{transform_indices = @transform_0, window_bounds = array<i64: 1, 1, 8, 8>}, {transform_indices = @transform_1, window_bounds = array<i64: 1, 1, 8, 8>}, {transform_indices = @transform_2, window_bounds = array<i64: 1, 1, 8, 8>}, {transform_indices = @transform_3, window_bounds = array<i64: 1, 1, 8, 8>}, {transform_indices = @transform_4, window_bounds = array<i64: 1, 8, 32>}, {transform_indices = @transform_5, window_bounds = array<i64: 1, 8, 32>}]} {
    %c0_i32 = arith.constant 0 : i32
    %0 = arith.cmpi eq, %arg2, %c0_i32 : i32
    %1 = arith.extui %0 : i1 to i32
    %c0_i32_0 = arith.constant 0 : i32
    %2 = arith.cmpi ne, %1, %c0_i32_0 : i32
    scf.if %2 {
      %cst_29 = arith.constant 0.000000e+00 : f32
      %37 = vector.broadcast %cst_29 : f32 to vector<8x32xf32>
      %c0_30 = arith.constant 0 : index
      %c0_31 = arith.constant 0 : index
      %38 = vector.load %arg9[%c0_30, %c0_31] : memref<8x32xf32, #tpu.memory_space<vmem>>, vector<8x32xf32>
      tpu.vector_store %arg9[%c0_30, %c0_31], %37 {strides = array<i32>} : memref<8x32xf32, #tpu.memory_space<vmem>>, vector<8x32xf32>,
    } else {
    }
    %c0 = arith.constant 0 : index
    %c0_1 = arith.constant 0 : index
    %c0_2 = arith.constant 0 : index
    %c0_3 = arith.constant 0 : index
    %3 = vector.load %arg3[%c0, %c0_1, %c0_2, %c0_3] : memref<1x1x8x8xbf16, #tpu.memory_space<vmem>>, vector<1x1x8x8xbf16>
    %4 = vector.shape_cast %3 : vector<1x1x8x8xbf16> to vector<8x8xbf16>
    %c0_4 = arith.constant 0 : index
    %c0_5 = arith.constant 0 : index
    %c0_6 = arith.constant 0 : index
    %c0_7 = arith.constant 0 : index
    %5 = vector.load %arg4[%c0_4, %c0_5, %c0_6, %c0_7] : memref<1x1x8x8xbf16, #tpu.memory_space<vmem>>, vector<1x1x8x8xbf16>
    %6 = vector.shape_cast %5 : vector<1x1x8x8xbf16> to vector<8x8xbf16>
    %c0_8 = arith.constant 0 : index
    %c0_9 = arith.constant 0 : index
    %c0_10 = arith.constant 0 : index
    %c0_11 = arith.constant 0 : index
    %7 = vector.load %arg5[%c0_8, %c0_9, %c0_10, %c0_11] : memref<1x1x8x8xbf16, #tpu.memory_space<vmem>>, vector<1x1x8x8xbf16>
    %8 = vector.shape_cast %7 : vector<1x1x8x8xbf16> to vector<8x8xbf16>
    %c0_12 = arith.constant 0 : index
    %c0_13 = arith.constant 0 : index
    %c0_14 = arith.constant 0 : index
    %9 = vector.load %arg7[%c0_12, %c0_13, %c0_14] : memref<1x8x32xbf16, #tpu.memory_space<vmem>>, vector<1x8x32xbf16>
    %10 = vector.shape_cast %9 : vector<1x8x32xbf16> to vector<8x32xbf16>
    %cst = arith.constant dense<0.000000e+00> : vector<8x8xf32>
    %11 = tpu.matmul %4, %6, %cst {dimension_numbers = #tpu.dot_dimension_numbers<[1], [1], [0], [0], [0, 0, 1, 0], [], []>} : vector<8x8xbf16>, vector<8x8xbf16>, vector<8x8xf32> -> vector<8x8xf32>
    %c0_15 = arith.constant 0 : index
    %c0_16 = arith.constant 0 : index
    %c0_17 = arith.constant 0 : index
    %c0_18 = arith.constant 0 : index
    %12 = vector.load %arg6[%c0_15, %c0_16, %c0_17, %c0_18] : memref<1x1x8x8xf32, #tpu.memory_space<vmem>>, vector<1x1x8x8xf32>
    %13 = vector.shape_cast %12 : vector<1x1x8x8xf32> to vector<8x8xf32>
    %cst_19 = arith.constant 1.000000e+09 : f32
    %14 = vector.broadcast %cst_19 : f32 to vector<8x8xf32>
    %15 = arith.mulf %13, %14 : vector<8x8xf32>
    %16 = arith.subf %11, %15 : vector<8x8xf32>
    %cst_20 = arith.constant dense<0xFF800000> : vector<8xf32>
    %17 = vector.multi_reduction <maximumf>, %16, %cst_20 [1] : vector<8x8xf32> to vector<8xf32>
    %18 = vector.shape_cast %17 : vector<8xf32> to vector<8x1xf32>
    %19 = vector.broadcast %18 : vector<8x1xf32> to vector<8x8xf32>
    %20 = arith.subf %16, %19 : vector<8x8xf32>
    %21 = math.exp %20 : vector<8x8xf32>
    %cst_21 = arith.constant dense<0.000000e+00> : vector<8xf32>
    %22 = vector.multi_reduction <add>, %21, %cst_21 [1] : vector<8x8xf32> to vector<8xf32>
    %23 = vector.shape_cast %22 : vector<8xf32> to vector<8x1xf32>
    %24 = tpu.reciprocal %23 : vector<8x1xf32> -> vector<8x1xf32>
    %25 = vector.broadcast %24 : vector<8x1xf32> to vector<8x8xf32>
    %26 = arith.mulf %21, %25 : vector<8x8xf32>
    %27 = arith.truncf %26 : vector<8x8xf32> to vector<8x8xbf16>
    %cst_22 = arith.constant dense<0.000000e+00> : vector<8x8xf32>
    %28 = tpu.matmul %27, %8, %cst_22 {dimension_numbers = #tpu.dot_dimension_numbers<[1], [0], [0], [1], [0, 0, 1, 1], [], []>} : vector<8x8xbf16>, vector<8x8xbf16>, vector<8x8xf32> -> vector<8x8xf32>
    %c0_23 = arith.constant 0 : index
    %c0_24 = arith.constant 0 : index
    %29 = vector.load %arg9[%c0_23, %c0_24] : memref<8x32xf32, #tpu.memory_space<vmem>>, vector<8x32xf32>
    %30 = arith.truncf %28 : vector<8x8xf32> to vector<8x8xbf16>
    %cst_25 = arith.constant dense<0.000000e+00> : vector<8x32xf32>
    %31 = tpu.matmul %30, %10, %cst_25 {dimension_numbers = #tpu.dot_dimension_numbers<[1], [0], [0], [1], [0, 0, 1, 1], [], []>} : vector<8x8xbf16>, vector<8x32xbf16>, vector<8x32xf32> -> vector<8x32xf32>
    %32 = arith.addf %29, %31 : vector<8x32xf32>
    %c0_26 = arith.constant 0 : index
    %c0_27 = arith.constant 0 : index
    %33 = vector.load %arg9[%c0_26, %c0_27] : memref<8x32xf32, #tpu.memory_space<vmem>>, vector<8x32xf32>
    tpu.vector_store %arg9[%c0_26, %c0_27], %32 {strides = array<i32>} : memref<8x32xf32, #tpu.memory_space<vmem>>, vector<8x32xf32>,
    %c3_i32 = arith.constant 3 : i32
    %34 = arith.cmpi eq, %arg2, %c3_i32 : i32
    %35 = arith.extui %34 : i1 to i32
    %c0_i32_28 = arith.constant 0 : i32
    %36 = arith.cmpi ne, %35, %c0_i32_28 : i32
    scf.if %36 {
      %c0_29 = arith.constant 0 : index
      %c0_30 = arith.constant 0 : index
      %37 = vector.load %arg9[%c0_29, %c0_30] : memref<8x32xf32, #tpu.memory_space<vmem>>, vector<8x32xf32>
      %c0_31 = arith.constant 0 : index
      %c0_32 = arith.constant 0 : index
      %c0_33 = arith.constant 0 : index
      %38 = vector.load %arg8[%c0_31, %c0_32, %c0_33] : memref<1x8x32xf32, #tpu.memory_space<vmem>>, vector<1x8x32xf32>
      %39 = vector.shape_cast %38 : vector<1x8x32xf32> to vector<8x32xf32>
      %40 = vector.shape_cast %37 : vector<8x32xf32> to vector<1x8x32xf32>
      tpu.vector_store %arg8[%c0_31, %c0_32, %c0_33], %40 {strides = array<i32>} : memref<1x8x32xf32, #tpu.memory_space<vmem>>, vector<1x8x32xf32>,
    } else {
    }
    return
  }
  func.func @transform_0(%arg0: i32, %arg1: i32, %arg2: i32) -> (i32, i32, i32, i32) {
    %c0_i32 = arith.constant 0 : i32
    %c0_i32_0 = arith.constant 0 : i32
    return %arg0, %arg2, %arg1, %c0_i32 : i32, i32, i32, i32
  }
  func.func @transform_1(%arg0: i32, %arg1: i32, %arg2: i32) -> (i32, i32, i32, i32) {
    %c0_i32 = arith.constant 0 : i32
    %c0_i32_0 = arith.constant 0 : i32
    %c0_i32_1 = arith.constant 0 : i32
    return %arg0, %arg2, %c0_i32, %c0_i32_0 : i32, i32, i32, i32
  }
  func.func @transform_2(%arg0: i32, %arg1: i32, %arg2: i32) -> (i32, i32, i32, i32) {
    %c0_i32 = arith.constant 0 : i32
    %c0_i32_0 = arith.constant 0 : i32
    %c0_i32_1 = arith.constant 0 : i32
    return %arg0, %arg2, %c0_i32, %c0_i32_0 : i32, i32, i32, i32
  }
  func.func @transform_3(%arg0: i32, %arg1: i32, %arg2: i32) -> (i32, i32, i32, i32) {
    %c0_i32 = arith.constant 0 : i32
    %c0_i32_0 = arith.constant 0 : i32
    %c0_i32_1 = arith.constant 0 : i32
    return %arg0, %c0_i32, %arg1, %c0_i32_0 : i32, i32, i32, i32
  }
  func.func @transform_4(%arg0: i32, %arg1: i32, %arg2: i32) -> (i32, i32, i32) {
    %c0_i32 = arith.constant 0 : i32
    %c0_i32_0 = arith.constant 0 : i32
    %c0_i32_1 = arith.constant 0 : i32
    return %arg2, %c0_i32, %c0_i32_0 : i32, i32, i32
  }
  func.func @transform_5(%arg0: i32, %arg1: i32, %arg2: i32) -> (i32, i32, i32) {
    %c0_i32 = arith.constant 0 : i32
    %c0_i32_0 = arith.constant 0 : i32
    return %arg0, %arg1, %c0_i32 : i32, i32, i32
  }
}

</mosaic_0001>

<bundles_post_ra>
// kernel: tpu_custom_call.1
= control target key start
LH: loop header
LB: loop body
LE: loop exit
PB: predicated region body
PF: predicated region fallthrough
CT: control target
= control target key end

     0   :  { %s1726_s0 = inlined_call_operand.hbm [shape: bf16[2,4,8,8], index: 0, kind: input, shape index: {}]   ;;  %s1727_s1 = inlined_call_operand.hbm [shape: bf16[2,4,8,8], index: 1, kind: input, shape index: {}]   ;;  %s1728_s2 = inlined_call_operand.hbm [shape: bf16[2,4,8,8], index: 2, kind: input, shape index: {}]   ;;  %s1729_s3 = inlined_call_operand.hbm [shape: f32[2,1,8,8], index: 3, kind: input, shape index: {}]   ;;  %s1730_s4 = inlined_call_operand.hbm [shape: bf16[4,8,32], index: 4, kind: input, shape index: {}]   ;;  %s1731_s5 = inlined_call_operand.hbm [shape: f32[2,8,32], index: 5, kind: output, shape index: {}]  }
   0x1   :  { %1752 = sst [smem:[#allocation32_spill]] %s1727_s1 }
   0x2   :  { %1753 = sst [smem:[#allocation33_spill]] %s1729_s3 }
   0x3   :  { %1754 = sst [smem:[#allocation34_spill]] %s1731_s5 }
   0x4   :  { %10 = vsyncpa [#allocation4], 0 }
   0x5   :  { %12 = vsyncpa [#allocation4 + $0x1], 0 }
   0x6   :  { %13 = vsyncpa [#allocation7], 0 }
   0x7   :  { %15 = vsyncpa [#allocation7 + $0x1], 0 }
   0x8   :  { %16 = vsyncpa [#allocation10], 0 }
   0x9   :  { %18 = vsyncpa [#allocation10 + $0x1], 0 }
   0xa   :  { %19 = vsyncpa [#allocation5], 0 }
   0xb   :  { %21 = vsyncpa [#allocation5 + $0x1], 0  ;;  %s1339_s18 = smov 0   ;;  %s1341_s19 = smov 0  }
   0xc   :  { %s1343_s20 = smov 0   ;;  %s1345_s21 = smov 0  }
   0xd   :  { %s1347_s22 = smov 0   ;;  %s1349_s23 = smov 0  }
   0xe   :  { %s1351_s24 = smov 0   ;;  %s1353_s25 = smov 0  }
   0xf   :  { %s1355_s26 = smov 0   ;;  %s1357_s27 = smov 0  }
  0x10   :  { %s1359_s28 = smov 0   ;;  %s1361_s29 = smov 0  }
  0x11   :  { %s1363_s30 = smov 0   ;;  %s1365_s6 = smov 0  }
  0x12 LB: > { %1755 = sst [smem:[#allocation18_spill]] %s1258_s21  ;;  %s1408_s7 = sadd.s32 4294967295, %s1298_s6   ;;  %s1298_s6 = sphi %s1365_s6, %s27_s6   ;;  %s1294_s30 = sphi %s1363_s30, %s1810_s30   ;;  %s1290_s29 = sphi %s1361_s29, %s1820_s29   ;;  %s1286_s28 = sphi %s1359_s28, %s1819_s28   ;;  %s1282_s27 = sphi %s1357_s27, %s1818_s27   ;;  %s1278_s26 = sphi %s1355_s26, %s1817_s26   ;;  %s1274_s25 = sphi %s1353_s25, %s1816_s25   ;;  %s1270_s24 = sphi %s1351_s24, %s1806_s24   ;;  %s1266_s23 = sphi %s1349_s23, %s1805_s23   ;;  %s1262_s22 = sphi %s1347_s22, %s1804_s22   ;;  %s1258_s21 = sphi %s1345_s21, %s1815_s21   ;;  %s1254_s20 = sphi %s1343_s20, %s1814_s20   ;;  %s1250_s19 = sphi %s1341_s19, %s1813_s19   ;;  %s1246_s18 = sphi %s1339_s18, %s1812_s18  }
  0x13   : > { %1756 = sst [smem:[#allocation19_spill]] %s1262_s22  ;;  %s39_s8 = sadd.s32 1, %s1290_s29 }
  0x14   : > { %1757 = sst [smem:[#allocation20_spill]] %s1266_s23  ;;  %p40_p0 = scmp.ge.s32.totalorder %s39_s8, 4 }
  0x15   : > { %1758 = sst [smem:[#allocation21_spill]] %s1274_s25  ;;  %s46_s9 = sadd.s32 1, %s1294_s30 }
  0x16   : > { %1759 = sst [smem:[#allocation22_spill]] %s1282_s27  ;;  %s57_s10 = sadd.s32 1, %s1278_s26 }
  0x17   : > { %1760 = sst [smem:[#allocation23_spill]] %s1286_s28  ;;  %p64_p1 = scmp.ne.s32.totalorder %s1278_s26, %s1274_s25 }
  0x18   : > { %1761 = sst [smem:[#allocation24_spill]] %s1294_s30  ;;  %s1822_s8 = smov (%p40_p0, %s39_s8), 0 }
  0x19   : > { %1762 = sst [smem:[#allocation25_spill]] %s1822_s8  ;;  %s1824_s9 = smov (!%p40_p0, %s46_s9), %s1294_s30 }
  0x1a   : > { %s1420_s11 = ssub.s32 %s1290_s29, %s1822_s8  ;;  %p1749_p2 = scmp.eq.s32.totalorder %s1298_s6, 0 }
  0x1b   : > { %p48_p3 = scmp.ge.s32.totalorder %s1824_s9, 2  ;;  %p70_p4 = scmp.ne.s32.totalorder %s1274_s25, %s1270_s24 }
  0x1c   : > { %p1426_p5 = por %p1749_p2, %p64_p1  ;;  %p1745_p6 = scmp.eq.s32.totalorder %s1408_s7, 0 }
  0x1d   : > { %s1826_s9 = smov (%p48_p3, %s1824_s9), 0  ;;  %p1739_p9 = scmp.lt.s32.totalorder %s1298_s6, 8 }
  0x1e   : > { %1764 = sst [smem:[#allocation26_spill]] %s1826_s9  ;;  %p1435_p7 = por %p1745_p6, %p70_p4 }
  0x1f   : > { %s1442_s14 = ssub.s32 %s1294_s30, %s1826_s9  ;;  %s1735_s16 = sand.u32 1, %s1278_s26  }
  0x20   : > { %s1765_s13 = scalar_select %p1435_p7, 1, 0 }
  0x21   : > { %s52_s15 = sor.u32 %s1420_s11, %s1442_s14  ;;  %s1450_s17 = sshll.u32 %s1735_s16, 2 }
  0x22   : > { %1766 = sst [smem:[#allocation27_spill]] %s1765_s13  ;;  %p55_p10 = scmp.eq.s32.totalorder %s52_s15, 0 }
  0x23   : > { %s797_s24 = sshll.u32 %s1294_s30, 2  ;;  %p1461_p11 = pnand %p1739_p9, %p1426_p5 }
  0x24   : > { %s1454_s8 = scalar_select %p55_p10, %s1278_s26, %s57_s10  }
  0x25   : > { %s242_s5 = sadd.s32 %s1290_s29, %s797_s24  ;;  %s1741_s15 = sand.u32 1, %s1298_s6  }
  0x26   : > { %1767 = sst [smem:[#allocation28_spill]] %s1454_s8  ;;  %s1465_s28 = sshll.u32 %s242_s5, 6 }
  0x27   : > { %s1769_s1 = sld [smem:[#allocation32_spill]]  ;;  %s257_s25 = scalar_lea.vmem [#allocation6], %s1450_s17 }
  0x28   : > { %s266_s10 = sshll.u32 %s257_s25, 4  ;;  %p809_p12 = scmp.ge.s32.totalorder %s1298_s6, 1  ;;  %s267_s10 = int_to_ptr.vmem [resolvable:$true] %s266_s10 }
  0x29   : > { %p328_p13 = scmp.lt.s32.totalorder %s1298_s6, 9  ;;  %s1477_s12 = scalar_lea.sflag [#allocation7], %s1741_s15 }
  0x2a   : > { %p1740_p0 = pneg %p1461_p11  ;;  %s1015_s24 = scalar_lea.vmem %s267_s10, 64 }
  0x2b   : > { %p1016_p1 = scmp.ne.s32.totalorder %s267_s10, %s1015_s24  ;;  %s1300_s5 = smov [#allocation6]  }
  0x2c   : > { %s1020_s8 = sshll.u32 %s1300_s5, 4  ;;  %s1021_s8 = int_to_ptr.vmem [resolvable:$false] %s1020_s8 }
  0x2d   : > { %s264_s13 = scalar_lea.hbm %s1769_s1, %s1465_s28  ;;  %p1018_p3 = pnand %p1016_p1, %p1740_p0 }
  0x2e   : > { %s1022_s27 = scalar_lea.vmem %s1021_s8, 128  ;;  %p1023_p5 = scmp.lt.s32.totalorder %s267_s10, %s1021_s8 }
  0x2f   : > { %p1019_p4 = pneg %p1018_p3  ;;  %p1024_p10 = scmp.lt.s32.totalorder %s1022_s27, %s1015_s24 }
  0x31   : > { %p1025_p8 = por %p1024_p10, %p1023_p5 }
  0x33   : > { %p1026_p9 = pnand %p1025_p8, %p1019_p4 }
  0x35   : > { %1029 = shalt.err (!%p1026_p9)
}
  0x36   : > { %867 = dma.hbm_to_vmem [thread:$0]  (!%p1461_p11), %s264_s13, 64, %s267_s10, %s1477_s12  }
  0x37   : > { %p1491_p8 = pnand %p809_p12, %p328_p13  ;;  %s793_s8 = sadd.s32 4294967294, %s1298_s6  }
  0x38   : > { %p139_p9 = scmp.eq.s32.totalorder %s1442_s14, 0  ;;  %s141_s16 = sadd.s32 1, %s1266_s23 }
  0x39   : > { %p148_p1 = scmp.ne.s32.totalorder %s1266_s23, %s1262_s22  ;;  %p154_p3 = scmp.ne.s32.totalorder %s1262_s22, %s1258_s21 }
  0x3a   : > { %s1503_s24 = scalar_select %p139_p9, %s1266_s23, %s141_s16  }
  0x3b   : > { %p150_p4 = por %p148_p1, %p1749_p2  ;;  %p1509_p5 = por %p154_p3, %p1745_p6 }
  0x3c   : > { %1771 = sst [smem:[#allocation29_spill]] %s1503_s24  ;;  %p206_p12 = scmp.eq.s32.totalorder %s1408_s7, 7 }
  0x3d   : > { %p212_p13 = scmp.eq.s32.totalorder %s793_s8, 7  ;;  %s295_s10 = sand.u32 1, %s1266_s23  }
  0x3e   : > { %p1515_p10 = por %p206_p12, %p148_p1  ;;  %s805_s27 = sshll.u32 %s295_s10, 3 }
  0x3f   : > { %p1519_p0 = por %p212_p13, %p154_p3  ;;  %s806_s16 = sshll.u32 %s1294_s30, 7 }
  0x40   : > { %s1773_s5 = scalar_select %p1515_p10, 1, 0 }
  0x41   : > { %s1775_s14 = scalar_select %p1519_p0, 1, 0 }
  0x42   : > { %1774 = sst [smem:[#allocation30_spill]] %s1773_s5  ;;  %s297_s21 = scalar_lea.vmem [#allocation9], %s805_s27 }
  0x43   : > { %1776 = sst [smem:[#allocation31_spill]] %s1775_s14  ;;  %s305_s22 = sshll.u32 %s297_s21, 4  ;;  %s306_s22 = int_to_ptr.vmem [resolvable:$true] %s305_s22 }
  0x44   : > { %s1777_s3 = sld [smem:[#allocation33_spill]]  ;;  %p1778_p9 = scmp.lt.s32.totalorder %s1298_s6, 8 }
  0x45   : > { %s1780_s23 = sand.u32 1, %s1298_s6   ;;  %s1043_s10 = scalar_lea.vmem %s306_s22, 128 }
  0x46   : > { %p1529_p6 = pnand %p1778_p9, %p150_p4  ;;  %s1535_s5 = scalar_lea.sflag [#allocation10], %s1780_s23 }
  0x47   : > { %p1044_p3 = scmp.ne.s32.totalorder %s306_s22, %s1043_s10  ;;  %s1301_s1 = smov [#allocation9]  }
  0x48   : > { %p1032_p1 = pneg %p1529_p6  ;;  %s1048_s15 = sshll.u32 %s1301_s1, 4  ;;  %s1049_s15 = int_to_ptr.vmem [resolvable:$false] %s1048_s15 }
  0x49   : > { %s1050_s21 = scalar_lea.vmem %s1049_s15, 256  ;;  %p1051_p2 = scmp.lt.s32.totalorder %s306_s22, %s1049_s15 }
  0x4a   : > { %s303_s24 = scalar_lea.hbm %s1777_s3, %s806_s16  ;;  %p1046_p12 = pnand %p1044_p3, %p1032_p1 }
  0x4b   : > { %p1052_p4 = scmp.lt.s32.totalorder %s1050_s21, %s1043_s10 }
  0x4c   : > { %p1047_p13 = pneg %p1046_p12 }
  0x4d   : > { %p1053_p9 = por %p1052_p4, %p1051_p2 }
  0x4f   : > { %p1054_p0 = pnand %p1053_p9, %p1047_p13 }
  0x51   : > { %1057 = shalt.err (!%p1054_p0)
}
  0x52   : > { %873 = dma.hbm_to_vmem [thread:$0]  (!%p1529_p6), %s303_s24, 128, %s306_s22, %s1535_s5  }
  0x53   : > { %s244_s16 = scalar_lea.hbm %s1726_s0, %s1465_s28  ;;  %s236_s1 = scalar_lea.vmem [#allocation3], %s1450_s17 }
  0x54   : > { %s246_s3 = sshll.u32 %s236_s1, 4  ;;  %s1781_s15 = sand.u32 1, %s1278_s26   ;;  %s247_s3 = int_to_ptr.vmem [resolvable:$true] %s246_s3 }
  0x55   : > { %s233_s10 = scalar_lea.sflag [#allocation4], %s1781_s15  ;;  %s1071_s21 = scalar_lea.vmem %s247_s3, 64 }
  0x56   : > { %p1072_p2 = scmp.ne.s32.totalorder %s247_s3, %s1071_s21  ;;  %p1782_p0 = pneg %p1461_p11 }
  0x57   : > { %s1302_s8 = smov [#allocation3]  }
  0x58   : > { %p1074_p1 = pnand %p1072_p2, %p1782_p0  ;;  %s1076_s30 = sshll.u32 %s1302_s8, 4  ;;  %s1077_s30 = int_to_ptr.vmem [resolvable:$false] %s1076_s30 }
  0x59   : > { %s1078_s14 = scalar_lea.vmem %s1077_s30, 128  ;;  %p1079_p6 = scmp.lt.s32.totalorder %s247_s3, %s1077_s30 }
  0x5a   : > { %p1075_p3 = pneg %p1074_p1  ;;  %p1080_p12 = scmp.lt.s32.totalorder %s1078_s14, %s1071_s21 }
  0x5c   : > { %p1081_p13 = por %p1080_p12, %p1079_p6 }
  0x5e   : > { %p1082_p4 = pnand %p1081_p13, %p1075_p3 }
  0x60   : > { %1085 = shalt.err (!%p1082_p4)
}
  0x61   : > { %864 = dma.hbm_to_vmem [thread:$0]  (!%p1461_p11), %s244_s16, 64, %s247_s3, %s233_s10  }
  0x62   : > { %s284_s23 = scalar_lea.hbm %s1728_s2, %s1465_s28  ;;  %s277_s27 = scalar_lea.vmem [#allocation8], %s1450_s17 }
  0x63   : > { %s286_s1 = sshll.u32 %s277_s27, 4  ;;  %p1783_p2 = pmov %p1782_p0  ;;  %s287_s1 = int_to_ptr.vmem [resolvable:$true] %s286_s1 }
  0x64   : > { %s1099_s15 = scalar_lea.vmem %s287_s1, 64  ;;  %s1303_s30 = smov [#allocation8]  }
  0x65   : > { %p1100_p9 = scmp.ne.s32.totalorder %s287_s1, %s1099_s15  ;;  %s1104_s14 = sshll.u32 %s1303_s30, 4  ;;  %s1105_s14 = int_to_ptr.vmem [resolvable:$false] %s1104_s14 }
  0x66   : > { %s1106_s21 = scalar_lea.vmem %s1105_s14, 128  ;;  %p1107_p3 = scmp.lt.s32.totalorder %s287_s1, %s1105_s14 }
  0x67   : > { %p1102_p0 = pnand %p1100_p9, %p1783_p2  ;;  %p1108_p6 = scmp.lt.s32.totalorder %s1106_s21, %s1099_s15 }
  0x69   : > { %p1103_p1 = pneg %p1102_p0  ;;  %p1109_p12 = por %p1108_p6, %p1107_p3 }
  0x6b   : > { %p1110_p13 = pnand %p1109_p12, %p1103_p1 }
  0x6d   : > { %1113 = shalt.err (!%p1110_p13)
}
  0x6e   : > { %870 = dma.hbm_to_vmem [thread:$0]  (!%p1461_p11), %s284_s23, 64, %s287_s1, %s1477_s12  }
  0x6f   : > { %s167_s3 = sadd.s32 1, %s1254_s20  ;;  %p1784_p4 = scmp.eq.s32.totalorder %s1420_s11, 0 }
  0x70   : > { %p174_p9 = scmp.ne.s32.totalorder %s1254_s20, %s1250_s19  ;;  %p180_p2 = scmp.ne.s32.totalorder %s1250_s19, %s1246_s18 }
  0x71   : > { %s1569_s28 = scalar_select %p1784_p4, %s1254_s20, %s167_s3  }
  0x72   : > { %s314_s9 = sand.u32 1, %s1254_s20   ;;  %s808_s17 = sshll.u32 %s1290_s29, 6 }
  0x73   : > { %p1785_p0 = scmp.eq.s32.totalorder %s1298_s6, 0  ;;  %p1786_p3 = scmp.eq.s32.totalorder %s1408_s7, 0 }
  0x74   : > { %s807_s10 = sshll.u32 %s314_s9, 2  ;;  %s321_s12 = scalar_lea.hbm %s1730_s4, %s808_s17 }
  0x75   : > { %p176_p1 = por %p174_p9, %p1785_p0  ;;  %p1581_p6 = por %p180_p2, %p1786_p3 }
  0x76   : > { %p1788_p11 = scmp.lt.s32.totalorder %s1298_s6, 8  ;;  %s316_s18 = scalar_lea.vmem [#allocation11], %s807_s10 }
  0x77   : > { %s323_s24 = sshll.u32 %s316_s18, 4  ;;  %s1304_s27 = smov [#allocation11]   ;;  %s324_s24 = int_to_ptr.vmem [resolvable:$true] %s323_s24 }
  0x78   : > { %p1590_p12 = pnand %p1788_p11, %p176_p1  ;;  %s1127_s23 = scalar_lea.vmem %s324_s24, 64 }
  0x79   : > { %p1128_p4 = scmp.ne.s32.totalorder %s324_s24, %s1127_s23  ;;  %s1132_s1 = sshll.u32 %s1304_s27, 4  ;;  %s1133_s1 = int_to_ptr.vmem [resolvable:$false] %s1132_s1 }
  0x7a   : > { %p1116_p13 = pneg %p1590_p12  ;;  %s1134_s15 = scalar_lea.vmem %s1133_s1, 128 }
  0x7b   : > { %p1135_p0 = scmp.lt.s32.totalorder %s324_s24, %s1133_s1  ;;  %p1136_p3 = scmp.lt.s32.totalorder %s1134_s15, %s1127_s23 }
  0x7c   : > { %p1130_p9 = pnand %p1128_p4, %p1116_p13 }
  0x7d   : > { %p1137_p1 = por %p1136_p3, %p1135_p0 }
  0x7e   : > { %p1131_p2 = pneg %p1130_p9 }
  0x80   : > { %p1138_p11 = pnand %p1137_p1, %p1131_p2 }
  0x82   : > { %1141 = shalt.err (!%p1138_p11)
}
  0x83   : > { %876 = dma.hbm_to_vmem [thread:$0]  (!%p1590_p12), %s321_s12, 64, %s324_s24, %s1535_s5  }
  0x84   : > { %332 = sbr.rel (%p1491_p8) target bundleno = 1115 (0x45b), region = 40  ;;  %s1790_s30 = sld [smem:[#allocation21_spill]] (!%p1491_p8) }
  0x8a   : > { %s334_s21 = sand.u32 1, %s1790_s30  }
  0x8b   : > { %s1602_s3 = sshll.u32 %s334_s21, 2  ;;  %s335_s9 = scalar_lea.sflag [#allocation4], %s334_s21 }
  0x8c   : > { %s338_s17 = scalar_lea.vmem [#allocation3], %s1602_s3 }
  0x8d   : > { %1225 = dma.done.wait (%p1435_p7), %s335_s9, 64  }
  0x8e   : > { %1227 = vsyncadd (%p1435_p7), %s335_s9, 4294967232  ;;  %s343_s5 = sand.u32 1, %s1408_s7   ;;  %s347_s25 = scalar_lea.vmem [#allocation6], %s1602_s3 }
  0x8f   : > { %s344_s10 = scalar_lea.sflag [#allocation7], %s343_s5 }
  0x90   : > { %1229 = dma.done.wait (%p1435_p7), %s344_s10, 128  }
  0x91   : > { %1231 = vsyncadd (%p1435_p7), %s344_s10, 4294967168  ;;  %s1792_s8 = sld [smem:[#allocation19_spill]]  ;;  %s356_s11 = scalar_lea.vmem [#allocation8], %s1602_s3 }
  0x92   : > { %s362_s18 = scalar_lea.sflag [#allocation10], %s343_s5 }
  0x97   : > { %s363_s22 = sand.u32 1, %s1792_s8  }
  0x98   : > { %s1618_s12 = sshll.u32 %s363_s22, 3 }
  0x99   : > { %s365_s24 = scalar_lea.vmem [#allocation9], %s1618_s12 }
  0x9a   : > { %1233 = dma.done.wait (%p1509_p5), %s362_s18, 128  }
  0x9b   : > { %1235 = vsyncadd (%p1509_p5), %s362_s18, 4294967168  ;;  %s372_s7 = sand.u32 1, %s1250_s19  }
  0x9c   : > { %s1627_s23 = sshll.u32 %s372_s7, 2 }
  0x9d   : > { %s374_s27 = scalar_lea.vmem [#allocation11], %s1627_s23 }
  0x9e   : > { %1237 = dma.done.wait (%p1581_p6), %s362_s18, 64  }
  0x9f   : > { %1239 = vsyncadd (%p1581_p6), %s362_s18, 4294967232  ;;  %s420_s1 = scalar_lea.vmem [#allocation12], %s1618_s12  ;;  %s1793_s15 = sld [smem:[#allocation22_spill]] }
  0xa5   : > { %p816_p7 = scmp.ne.s32.totalorder %s1793_s15, 0 }
  0xa7   : > { %425 = sbr.rel (%p816_p7) target bundleno = 174 (0xae), region = 64 }
  0xac   : > { %vm426_vm0 = vcmask 261120   ;;  %v1305_v0 = vmov 0.0  }
  0xad   : > { %427 = vst.msk [vmem:[#allocation2] sm:$0xff] %vm426_vm0, %v1305_v0 }
  0xae PF: > { %v429_v1 = vld [vmem:[%s347_s25] sm:$0xf]  ;;  %vm432_vm1 = vcmask 64512   ;;  %v1306_v2 = vmov 0.0   ;;  %vm1307_vm2 = vmmov 0   ;;  %v479_v5 = vld [vmem:[%s365_s24] sm:$0xff] }
  0xaf   : > { %831 = vmatprep.subr.bf16.mxu0 %v1306_v2  ;;  %v437_v3 = vsel %vm432_vm1, %v429_v1, 0  ;;  %833 = vmatprep.mubr.msk.bf16.mxu0 %vm1307_vm2, %v1306_v2  ;;  %v428_v4 = vld [vmem:[%s338_s17] sm:$0xf]  ;;  %v480_v6 = vmul.f32 1e+09, %v479_v5  ;;  %vm497_vm3 = vcmask 1043456  }
  0xb0   : > { %832 = vmatpush3.bf16.xpose.msra.mxu0 %v437_v3  ;;  %837 = vmatprep.subr.bf16.mxu1 %v1306_v2  ;;  %v430_v18 = vld [vmem:[%s356_s11] sm:$0xf]  ;;  %v431_v22 = vld [vmem:[%s374_s27] sm:$0xf]  ;;  %vm590_vm4 = vcmask 261120   ;;  %s1794_s13 = sld [smem:[#allocation22_spill]] }
  0xb1   : > { %839 = vmatprep.mubr.msk.bf16.mxu1 %vm1307_vm2, %v1306_v2  ;;  %v499_v19 = vsel %vm497_vm3, %v430_v18, 0  ;;  %v547_v24 = vsel %vm497_vm3, %v431_v22, 0 }
  0xb2   : > { %838 = vmatpush3.bf16.msra.mxu1 %v499_v19 }
  0xb3   : > { %843 = vmatprep.subr.bf16.mxu1 %v1306_v2 }
  0xb4   : > { %v541_v31 = vld [vmem:[#allocation2] sm:$0xff] }
  0xb6   : > { %p820_p8 = scmp.ne.s32.totalorder %s1794_s13, 3 }
  0xb7   : > { %834 = vmatmul.mubr.msk.bf16.vlgmr.msra.gmra.mxu0 %vm432_vm1, %v428_v4 }
 0x177   : > { %v473_v7 = vpop.f32.mrf.mxu0 }
 0x178   : > { %v481_v8 = vsub.f32 %v473_v7, %v480_v6 }
 0x179   : > { %v835_v9 = vpop.f32.mrf.mxu0 }
 0x17a   : > { %v482_v10 = vsel %vm432_vm1, %v481_v8, -inf }
 0x17b   : > { %483 = vmax.xlane.f32.xlu0 %v482_v10  ;;  %v476_v11 = vpop.f32.mrf.mxu0 }
 0x17d   : > { %v836_v12 = vpop.f32.mrf.mxu0 }
 0x204   : > { %v484_v13 = vpop.xlane.xlu0 %483 }
 0x205   : > { %v485_v14 = vsub.f32 %v481_v8, %v484_v13 }
 0x207   : > { %v486_v15 = vmul.f32 1.442695, %v485_v14 }
 0x209   : > { %998 = vpow2.f32 %v486_v15 }
 0x216   : > { %v999_v16 = vpop.eup %998 }
 0x217   : > { %v488_v17 = vsel %vm432_vm1, %v999_v16, 0.0 }
 0x218   : > { %489 = vadd.xlane.f32.xlu0 %v488_v17 }
 0x2a1   : > { %v490_v20 = vpop.xlane.xlu0 %489 }
 0x2a2   : > { %1000 = vrcp.f32 %v490_v20 }
 0x2af   : > { %v1001_v21 = vpop.eup %1000 }
 0x2b0   : > { %v492_v23 = vmul.f32 %v1001_v21, %v999_v16 }
 0x2b2   : > { %v493_v25 = vpack.c.bf16 %v492_v23, %v492_v23 }
 0x2b4   : > { %840 = vmatmul.mubr.msk.bf16.vlgmr.msra.gmra.mxu1 %vm432_vm1, %v493_v25 }
 0x2b5   : > { %844 = vmatpush3.bf16.msra.mxu1 %v547_v24  ;;  %845 = vmatprep.mubr.msk.bf16.mxu1 %vm1307_vm2, %v1306_v2 }
 0x374   : > { %v535_v26 = vpop.f32.mrf.mxu1 }
 0x375   : > { %v542_v27 = vpack.c.bf16 %v535_v26, %v535_v26 }
 0x376   : > { %v841_v28 = vpop.f32.mrf.mxu1 }
 0x377   : > { %846 = vmatmul.mubr.msk.bf16.vlgmr.msra.gmra.mxu1 %vm432_vm1, %v542_v27 }
 0x378   : > { %v538_v29 = vpop.f32.mrf.mxu1 }
 0x37a   : > { %v842_v30 = vpop.f32.mrf.mxu1 }
 0x437   : > { %v583_v32 = vpop.f32.mrf.mxu1 }
 0x438   : > { %v589_v33 = vadd.f32 %v583_v32, %v541_v31 }
 0x439   : > { %v847_v34 = vpop.f32.mrf.mxu1  ;;  %595 = sbr.rel (%p820_p8) target bundleno = 1091 (0x443), region = 68 }
 0x43a   : > { %591 = vst.msk [vmem:[#allocation2] sm:$0xff] %vm590_vm4, %v589_v33 }
 0x43b   : > { %v586_v35 = vpop.f32.mrf.mxu1 }
 0x43d   : > { %v848_v36 = vpop.f32.mrf.mxu1 }
 0x441   : > { %v596_v37 = vld [vmem:[#allocation2] sm:$0xff] }
 0x442   : > { %597 = vst.msk [vmem:[%s420_s1] sm:$0xff] %vm590_vm4, %v596_v37 }
 0x443 PF: > { %s1795_s16 = sld [smem:[#allocation23_spill]]  ;;  %s613_s10 = sshll.u32 %s420_s1, 4  ;;  %s614_s10 = int_to_ptr.vmem [resolvable:$true] %s613_s10 }
 0x444   : > { %s1798_s17 = sld [smem:[#allocation34_spill]]  ;;  %s599_s25 = scalar_lea.sflag [#allocation5], %s363_s22 }
 0x445   : > { %s1142_s8 = scalar_lea.vmem %s614_s10, 128  ;;  %s1308_s11 = smov [#allocation12]  }
 0x446   : > { %p1143_p5 = scmp.ne.s32.totalorder %s614_s10, %s1142_s8  ;;  %s1146_s18 = sshll.u32 %s1308_s11, 4  ;;  %s1147_s18 = int_to_ptr.vmem [resolvable:$false] %s1146_s18 }
 0x447   : > { %s1148_s24 = scalar_lea.vmem %s1147_s18, 256  ;;  %p1149_p13 = scmp.lt.s32.totalorder %s614_s10, %s1147_s18 }
 0x448   : > { %p1144_p6 = pnand %p1143_p5, %p1515_p10  ;;  %p1150_p4 = scmp.lt.s32.totalorder %s1148_s24, %s1142_s8 }
 0x449   : > { %s822_s21 = sshll.u32 %s1795_s16, 7 }
 0x44a   : > { %s611_s5 = scalar_lea.hbm %s1798_s17, %s822_s21  ;;  %p1145_p12 = pneg %p1144_p6 }
 0x44b   : > { %p1151_p9 = por %p1150_p4, %p1149_p13 }
 0x44d   : > { %p1152_p2 = pnand %p1151_p9, %p1145_p12 }
 0x44f   : > { %1155 = shalt.err (!%p1152_p2)
}
 0x450   : > { %s1156_s7 = scalar_lea.hbm %s611_s5, 128  ;;  %s1160_s23 = scalar_lea.hbm %s1798_s17, 256 }
 0x451   : > { %p1157_p0 = scmp.ne.s32.totalorder %s611_s5, %s1156_s7  ;;  %p1161_p11 = scmp.lt.s32.totalorder %s611_s5, %s1798_s17 }
 0x452   : > { %p1162_p7 = scmp.lt.s32.totalorder %s1160_s23, %s1156_s7 }
 0x453   : > { %p1158_p3 = pnand %p1157_p0, %p1515_p10 }
 0x454   : > { %p1163_p8 = por %p1162_p7, %p1161_p11 }
 0x455   : > { %p1159_p1 = pneg %p1158_p3 }
 0x457   : > { %p1164_p5 = pnand %p1163_p8, %p1159_p1 }
 0x459   : > { %1167 = shalt.err (!%p1164_p5)
}
 0x45a   : > { %859 = dma.vmem_to_hbm [thread:$0]  (%p1515_p10), %s614_s10, 128, %s611_s5, %s599_s25  }
 0x45b PF: > { %s1799_s15 = sld [smem:[#allocation18_spill]]  ;;  %p882_p6 = scmp.ge.s32.totalorder %s1298_s6, 2 }
 0x45c   : > { %s1800_s13 = sld [smem:[#allocation31_spill]] }
 0x461   : > { %s625_s16 = sand.u32 1, %s1799_s15  }
 0x462   : > { %p1801_p12 = scmp.ne.s32.totalorder %s1800_s13, 0  ;;  %s626_s30 = scalar_lea.sflag [#allocation5], %s625_s16 }
 0x464   : > { %p878_p13 = pnand %p882_p6, %p1801_p12 }
 0x466   : > { %p879_p4 = pneg %p878_p13 }
 0x468   : > { %1241 = dma.done.wait (%p879_p4), %s626_s30, 128  }
 0x469   : > { %1243 = vsyncadd (%p879_p4), %s626_s30, 4294967168  ;;  %s27_s6 = sadd.s32 1, %s1298_s6   ;;  %s1803_s14 = sld [smem:[#allocation19_spill]] }
 0x46a   : > { %p1679_p9 = scmp.ge.s32.totalorder %s27_s6, 10   ;;  %s1804_s22 = sld [smem:[#allocation20_spill]] }
 0x46b   : > { %s1805_s23 = sld [smem:[#allocation29_spill]]  ;;  %s1812_s18 = smov %s1250_s19 }
 0x46c   : > { %s1806_s24 = sld [smem:[#allocation21_spill]]  ;;  %s1813_s19 = smov %s1254_s20 }
 0x46d   : > { %s1807_s3 = sld [smem:[#allocation28_spill]]  ;;  %s1814_s20 = smov %s1569_s28 }
 0x46e   : > { %s1808_s9 = sld [smem:[#allocation24_spill]]  ;;  %s1816_s25 = smov %s1278_s26 }
 0x46f   : > { %s1809_s5 = sld [smem:[#allocation25_spill]]  ;;  %s1815_s21 = smov %s1803_s14 }
 0x470   : > { %s1810_s30 = sld [smem:[#allocation26_spill]]  ;;  %s1818_s27 = smov %s1290_s29 }
 0x471   :  { %26 = sbr.rel (!%p1679_p9) target bundleno = 18 (0x12), region = 141 }
 0x473   : > { %s1817_s26 = smov %s1807_s3 }
 0x474   : > { %s1819_s28 = smov %s1808_s9 }
 0x475   : > { %s1820_s29 = smov %s1809_s5 }
 0x476   :  { %631 = vsyncpa [#allocation4], 1 }
 0x477   :  { %633 = vsyncpa [#allocation4 + $0x1], 1 }
 0x478   :  { %634 = vsyncpa [#allocation7], 1 }
 0x479   :  { %636 = vsyncpa [#allocation7 + $0x1], 1 }
 0x47a   :  { %637 = vsyncpa [#allocation10], 1 }
 0x47b   :  { %639 = vsyncpa [#allocation10 + $0x1], 1 }
 0x47c   :  { %640 = vsyncpa [#allocation5], 1 }
 0x47d   :  { %642 = vsyncpa [#allocation5 + $0x1], 1 }

</bundles_post_ra>
